<compile_context>
chip_gen: v7x
topology: tpu7x:2x2x1
jax: 0.10.0
libtpu: 0.0.40
codegen_flags: <defaults>
</compile_context>

<pallas_src>
import functools
import numpy as np
import jax
import jax.numpy as jnp
from jax import lax
from jax.experimental import pallas as pl
from jax.experimental.pallas import tpu as pltpu


def _round_up(x, m):
    return ((x + m - 1) // m) * m


# ---------------------------------------------------------------------------
# Pallas kernel: all LSTM layers + Linear + LogSoftmax in one call.
# ---------------------------------------------------------------------------
def lstm_forward_kernel(maxlen_sm,                       # SMEM (1,) i32 (scalar prefetch)
                        len_col_ref,                     # (Bp, 1) i32
                        x_ref,                           # (T, Bp, P) f32  embedded input
                        w_ref,                           # (1, 2P, 4P) bf16 fused [W_ih;W_hh]
                        b_ref,                           # (1, 1, 4P) f32  b_ih + b_hh
                        lw_ref,                          # (2P, Op) f32    padded Linear W^T
                        lb_ref,                          # (1, Op) f32     padded Linear b
                        out_ref,                         # (Bp, Op) f32    log-probs
                        hid_ref,                         # (Bp, 2P) f32    [h_{L-2}, h_{L-1}]
                        y_ref,                           # (T, Bp, P) f32  top-layer outputs
                        buf,                             # VMEM (T, Bp, P) f32 rolling layer io
                        h_sc, c_sc,                      # VMEM (Bp, P) f32
                        *, num_valid_out):
    l = pl.program_id(0)
    L = pl.num_programs(0)
    Bp, P = h_sc.shape

    # Layer 0 consumes the embedded input; later layers consume the previous
    # layer's output, which the previous grid step left in `buf`.
    @pl.when(l == 0)
    def _():
        buf[...] = x_ref[...]

    # Each layer starts from zero state (no initial (h0, c0) passed in PyTorch).
    h_sc[...] = jnp.zeros_like(h_sc)
    c_sc[...] = jnp.zeros_like(c_sc)

    # Hoist loop-invariant values (broadcasts are NOT CSE'd by JAX).
    bias = jnp.broadcast_to(b_ref[0], (Bp, 4 * P))       # (Bp, 4P) f32
    len_col = len_col_ref[...]                           # (Bp, 1) i32
    max_len = maxlen_sm[0]                               # scalar: skip fully-padded steps

    @pl.loop(0, max_len)
    def _(t):
        x_t = buf[t]                                                  # (Bp, P) f32
        xh = jnp.concatenate([x_t, h_sc[...]], axis=1)                # (Bp, 2P)
        gates = jnp.dot(xh.astype(jnp.bfloat16), w_ref[0],
                        preferred_element_type=jnp.float32) + bias    # (Bp, 4P) f32
        # PyTorch gate order [i, f, g, o]; each gate is 128-lane aligned.
        i_g = jax.nn.sigmoid(gates[:, 0 * P:1 * P])
        f_g = jax.nn.sigmoid(gates[:, 1 * P:2 * P])
        g_g = jnp.tanh(gates[:, 2 * P:3 * P])
        o_g = jax.nn.sigmoid(gates[:, 3 * P:4 * P])
        c_new = f_g * c_sc[...] + i_g * g_g
        h_new = o_g * jnp.tanh(c_new)
        # Packed-sequence semantics: freeze state for t >= length[b].
        valid = t < len_col                                           # (Bp, 1) bool
        c_sc[...] = jnp.where(valid, c_new, c_sc[...])
        h_sc[...] = jnp.where(valid, h_new, h_sc[...])
        buf[t] = h_sc[...]            # becomes the next layer's input at step t

    # hidden = cat(hidden[-2], hidden[-1], dim=1): write finals only once.
    @pl.when(l == L - 2)
    def _():
        hid_ref[:, :P] = h_sc[...]

    @pl.when(l == L - 1)
    def _():
        hid_ref[:, P:] = h_sc[...]
        y_ref[...] = buf[...]                      # top-layer per-step outputs
        # Fused Linear(2H -> O) + LogSoftmax(dim=1) on the padded hidden concat.
        z = (jnp.dot(hid_ref[...], lw_ref[...],
                     preferred_element_type=jnp.float32) + lb_ref[...])
        col = lax.broadcasted_iota(jnp.int32, z.shape, 1)
        z = jnp.where(col < num_valid_out, z, jnp.float32(-1e30))
        m = jnp.max(z, axis=1, keepdims=True)
        lse = m + jnp.log(jnp.sum(jnp.exp(z - m), axis=1, keepdims=True))
        out_ref[...] = z - lse


def lstm_forward_pallas(maxlen_sm, lens_col, x, w, b, lw, lb,
                        *, T, Bp, P, Op, L, O):
    kernel = functools.partial(lstm_forward_kernel, num_valid_out=O)
    grid_spec = pltpu.PrefetchScalarGridSpec(
        num_scalar_prefetch=1,
        grid=(L,),
        in_specs=[
            pl.BlockSpec((Bp, 1), lambda l, ml: (0, 0)),              # lengths column
            pl.BlockSpec((T, Bp, P), lambda l, ml: (0, 0, 0)),        # embedded input
            pl.BlockSpec((1, 2 * P, 4 * P), lambda l, ml: (l, 0, 0)), # fused W (per layer)
            pl.BlockSpec((1, 1, 4 * P), lambda l, ml: (l, 0, 0)),     # fused bias
            pl.BlockSpec((2 * P, Op), lambda l, ml: (0, 0)),          # linear W (padded)
            pl.BlockSpec((1, Op), lambda l, ml: (0, 0)),              # linear b (padded)
        ],
        out_specs=[
            pl.BlockSpec((Bp, Op), lambda l, ml: (0, 0)),             # log-probs
            pl.BlockSpec((Bp, 2 * P), lambda l, ml: (0, 0)),          # hidden concat
            pl.BlockSpec((T, Bp, P), lambda l, ml: (0, 0, 0)),        # top-layer outputs
        ],
        scratch_shapes=[
            pltpu.VMEM((T, Bp, P), jnp.float32),                      # rolling layer io
            pltpu.VMEM((Bp, P), jnp.float32),                         # h
            pltpu.VMEM((Bp, P), jnp.float32),                         # c
        ],
    )
    return pl.pallas_call(
        kernel,
        out_shape=(jax.ShapeDtypeStruct((Bp, Op), jnp.float32),
                   jax.ShapeDtypeStruct((Bp, 2 * P), jnp.float32),
                   jax.ShapeDtypeStruct((T, Bp, P), jnp.float32)),
        grid_spec=grid_spec,
        compiler_params=pltpu.CompilerParams(
            dimension_semantics=("arbitrary",),        # layers are sequential
            vmem_limit_bytes=32 * 1024 * 1024),
    )(maxlen_sm, lens_col, x, w, b, lw, lb)


# ---------------------------------------------------------------------------
# Forward wrapper (embedding gather + padding + packed_output gather are glue).
# ---------------------------------------------------------------------------
def lstm_sentiment_forward(params, text, text_lengths):
    """Reproduces LSTM_sentiment.forward. Returns (outputs, hidden, packed_output.data)."""
    d = params["dims"]
    E, H, O, P, Op, L = d["E"], d["H"], d["O"], d["P"], d["Op"], d["L"]
    B, T = text.shape
    Bp = _round_up(max(B, 8), 8)

    embedded = jnp.take(params["embedding"], text, axis=0)            # (B, T, E)
    x = jnp.transpose(embedded, (1, 0, 2)).astype(jnp.float32)        # (T, B, E)
    x = jnp.pad(x, ((0, 0), (0, Bp - B), (0, P - E)))                 # (T, Bp, P)

    lens_np = np.asarray(text_lengths, np.int32)                      # sorted desc
    lens_pad = np.zeros((Bp,), np.int32)
    lens_pad[:B] = lens_np                                            # pad rows -> len 0
    lens_col = jnp.asarray(lens_pad.reshape(Bp, 1))
    maxlen_sm = jnp.asarray([int(lens_np.max())], jnp.int32)

    out_pad, hid_pad, y_pad = lstm_forward_pallas(
        maxlen_sm, lens_col, x, params["w"], params["b"],
        params["lw"], params["lb"],
        T=T, Bp=Bp, P=P, Op=Op, L=L, O=O)

    outputs = out_pad[:B, :O]
    hidden = jnp.concatenate([hid_pad[:B, :H], hid_pad[:B, P:P + H]], axis=1)

    # packed_output.data equivalent: single precomputed gather in PackedSequence
    # order (time-major, batch sizes descending; lengths sorted descending as
    # required by pack_padded_sequence(enforce_sorted=True)).
    idx_chunks = []
    for t in range(T):
        bs = int((lens_np > t).sum())
        if bs > 0:
            idx_chunks.append(np.arange(bs, dtype=np.int32) * T + t)
    idx = jnp.asarray(np.concatenate(idx_chunks))
    y_bt = jnp.transpose(y_pad, (1, 0, 2))[:B].reshape(B * T, P)      # (B*T, P)
    packed_output = jnp.take(y_bt, idx, axis=0)[:, :H]                # (sum(len), H)
    # TODO(synk): PyTorch returns a PackedSequence object; we return its .data tensor.

    return outputs, hidden, packed_output


# ---------------------------------------------------------------------------
# Deterministic parameter construction (matches nn.Module shapes, then fuses/
# pads/casts into the kernel layout).
# ---------------------------------------------------------------------------
def make_params(vocab_size, embedding_dim, hidden_dim, output_dim, n_layers, key):
    assert n_layers >= 2, "hidden[-2] requires at least 2 LSTM layers"
    E, H, O = embedding_dim, hidden_dim, output_dim
    P = _round_up(max(E, H), 128)           # shared padded feature width
    Op = _round_up(O, 128)

    keys = jax.random.split(key, 3 + 4 * n_layers)
    scale = 1.0 / np.sqrt(H)

    emb = jax.random.normal(keys[0], (vocab_size, E), jnp.float32)
    lin_w = np.asarray(jax.random.uniform(keys[1], (O, 2 * H), jnp.float32,
                                          -scale, scale))             # PyTorch (out, in)
    lin_b = np.asarray(jax.random.uniform(keys[2], (O,), jnp.float32, -scale, scale))

    # Fused per-layer weight: rows [0, P) <- W_ih^T (in_dim rows used),
    # rows [P, 2P) <- W_hh^T (H rows used); gate g occupies columns [g*P, g*P+H).
    w_stack = np.zeros((n_layers, 2 * P, 4 * P), np.float32)
    b_stack = np.zeros((n_layers, 1, 4 * P), np.float32)
    for l in range(n_layers):
        in_dim = E if l == 0 else H
        k = keys[3 + 4 * l: 7 + 4 * l]
        w_ih = np.asarray(jax.random.uniform(k[0], (4 * H, in_dim), jnp.float32,
                                             -scale, scale))
        w_hh = np.asarray(jax.random.uniform(k[1], (4 * H, H), jnp.float32,
                                             -scale, scale))
        b_ih = np.asarray(jax.random.uniform(k[2], (4 * H,), jnp.float32, -scale, scale))
        b_hh = np.asarray(jax.random.uniform(k[3], (4 * H,), jnp.float32, -scale, scale))
        for g in range(4):                                 # PyTorch order [i, f, g, o]
            w_stack[l, :in_dim, g * P:g * P + H] = w_ih[g * H:(g + 1) * H, :].T
            w_stack[l, P:P + H, g * P:g * P + H] = w_hh[g * H:(g + 1) * H, :].T
            b_stack[l, 0, g * P:g * P + H] = b_ih[g * H:(g + 1) * H] + b_hh[g * H:(g + 1) * H]

    # Padded Linear: rows [0,H) multiply hidden[-2], rows [P,P+H) multiply hidden[-1].
    lw_pad = np.zeros((2 * P, Op), np.float32)
    lw_pad[:H, :O] = lin_w[:, :H].T
    lw_pad[P:P + H, :O] = lin_w[:, H:].T
    lb_pad = np.zeros((1, Op), np.float32)
    lb_pad[0, :O] = lin_b

    return {
        "embedding": emb,
        "w": jnp.asarray(w_stack, jnp.bfloat16),    # bf16 MXU operands
        "b": jnp.asarray(b_stack, jnp.float32),
        "lw": jnp.asarray(lw_pad, jnp.float32),
        "lb": jnp.asarray(lb_pad, jnp.float32),
        "dims": dict(E=E, H=H, O=O, P=P, Op=Op, L=n_layers),
    }


if __name__ == "__main__":
    vocab_size, embedding_dim, hidden_dim, output_dim, n_layers = 50, 32, 32, 3, 2
    B, T = 2, 8

    key = jax.random.PRNGKey(0)
    k_param, k_text = jax.random.split(key)
    params = make_params(vocab_size, embedding_dim, hidden_dim,
                         output_dim, n_layers, k_param)

    text = jax.random.randint(k_text, (B, T), 0, vocab_size, dtype=jnp.int32)
    # pack_padded_sequence default enforce_sorted=True -> lengths descending
    text_lengths = np.array([8, 5], dtype=np.int32)

    outputs, hidden, packed_output = lstm_sentiment_forward(params, text, text_lengths)
    jax.block_until_ready((outputs, hidden, packed_output))

    assert outputs.shape == (B, output_dim)
    assert hidden.shape == (B, 2 * hidden_dim)
    assert packed_output.shape == (int(text_lengths.sum()), hidden_dim)
    # log-softmax rows sum to 1 in prob space
    assert np.allclose(np.exp(np.asarray(outputs)).sum(axis=1), 1.0, atol=1e-4)

    print("KERNEL_OK")
</pallas_src>

<mosaic_0001>
module attributes {stable_mosaic.version = 11 : i64} {
  func.func @lstm_forward_kernel(%arg0: i32, %arg1: memref<1xi32, #tpu.memory_space<smem>>, %arg2: memref<8x1xi32, #tpu.memory_space<vmem>>, %arg3: memref<8x8x128xf32, #tpu.memory_space<vmem>>, %arg4: memref<1x256x512xbf16, #tpu.memory_space<vmem>>, %arg5: memref<1x1x512xf32, #tpu.memory_space<vmem>>, %arg6: memref<256x128xf32, #tpu.memory_space<vmem>>, %arg7: memref<1x128xf32, #tpu.memory_space<vmem>>, %arg8: memref<8x128xf32, #tpu.memory_space<vmem>>, %arg9: memref<8x256xf32, #tpu.memory_space<vmem>>, %arg10: memref<8x8x128xf32, #tpu.memory_space<vmem>>, %arg11: memref<8x8x128xf32, #tpu.memory_space<vmem>>, %arg12: memref<8x128xf32, #tpu.memory_space<vmem>>, %arg13: memref<8x128xf32, #tpu.memory_space<vmem>>) attributes {dimension_semantics = [#tpu.dimension_semantics<arbitrary>], iteration_bounds = array<i64: 2>, scalar_prefetch = 1 : i64, scratch_operands = 3 : i64, tpu.core_type = #tpu.core_type<tc>, window_params = [{pipeline_mode = #tpu.pipeline_mode<synchronous>, transform_indices = @transform_0, window_bounds = array<i64: 8, 1>}, {pipeline_mode = #tpu.pipeline_mode<synchronous>, transform_indices = @transform_1, window_bounds = array<i64: 8, 8, 128>}, {transform_indices = @transform_2, window_bounds = array<i64: 1, 256, 512>}, {transform_indices = @transform_3, window_bounds = array<i64: 1, 1, 512>}, {pipeline_mode = #tpu.pipeline_mode<synchronous>, transform_indices = @transform_4, window_bounds = array<i64: 256, 128>}, {pipeline_mode = #tpu.pipeline_mode<synchronous>, transform_indices = @transform_5, window_bounds = array<i64: 1, 128>}, {pipeline_mode = #tpu.pipeline_mode<synchronous>, transform_indices = @transform_6, window_bounds = array<i64: 8, 128>}, {pipeline_mode = #tpu.pipeline_mode<synchronous>, transform_indices = @transform_7, window_bounds = array<i64: 8, 256>}, {pipeline_mode = #tpu.pipeline_mode<synchronous>, transform_indices = @transform_8, window_bounds = array<i64: 8, 8, 128>}]} {
    %c0_i32 = arith.constant 0 : i32
    %0 = arith.cmpi eq, %arg0, %c0_i32 : i32
    %1 = arith.extui %0 : i1 to i32
    %c0_i32_0 = arith.constant 0 : i32
    %2 = arith.cmpi ne, %1, %c0_i32_0 : i32
    scf.if %2 {
      %c0_22 = arith.constant 0 : index
      %c0_23 = arith.constant 0 : index
      %c0_24 = arith.constant 0 : index
      %25 = vector.load %arg3[%c0_22, %c0_23, %c0_24] : memref<8x8x128xf32, #tpu.memory_space<vmem>>, vector<8x8x128xf32>
      %c0_25 = arith.constant 0 : index
      %c0_26 = arith.constant 0 : index
      %c0_27 = arith.constant 0 : index
      %26 = vector.load %arg11[%c0_25, %c0_26, %c0_27] : memref<8x8x128xf32, #tpu.memory_space<vmem>>, vector<8x8x128xf32>
      tpu.vector_store %arg11[%c0_25, %c0_26, %c0_27], %25 {strides = array<i32>} : memref<8x8x128xf32, #tpu.memory_space<vmem>>, vector<8x8x128xf32>,
    } else {
    }
    %cst = arith.constant 0.000000e+00 : f32
    %3 = vector.broadcast %cst : f32 to vector<8x128xf32>
    %c0 = arith.constant 0 : index
    %c0_1 = arith.constant 0 : index
    %4 = vector.load %arg12[%c0, %c0_1] : memref<8x128xf32, #tpu.memory_space<vmem>>, vector<8x128xf32>
    tpu.vector_store %arg12[%c0, %c0_1], %3 {strides = array<i32>} : memref<8x128xf32, #tpu.memory_space<vmem>>, vector<8x128xf32>,
    %cst_2 = arith.constant 0.000000e+00 : f32
    %5 = vector.broadcast %cst_2 : f32 to vector<8x128xf32>
    %c0_3 = arith.constant 0 : index
    %c0_4 = arith.constant 0 : index
    %6 = vector.load %arg13[%c0_3, %c0_4] : memref<8x128xf32, #tpu.memory_space<vmem>>, vector<8x128xf32>
    tpu.vector_store %arg13[%c0_3, %c0_4], %5 {strides = array<i32>} : memref<8x128xf32, #tpu.memory_space<vmem>>, vector<8x128xf32>,
    %c0_5 = arith.constant 0 : index
    %c0_6 = arith.constant 0 : index
    %c0_7 = arith.constant 0 : index
    %7 = vector.load %arg5[%c0_5, %c0_6, %c0_7] : memref<1x1x512xf32, #tpu.memory_space<vmem>>, vector<1x1x512xf32>
    %8 = vector.shape_cast %7 : vector<1x1x512xf32> to vector<1x512xf32>
    %9 = vector.shape_cast %8 : vector<1x512xf32> to vector<1x512xf32>
    %10 = vector.broadcast %9 : vector<1x512xf32> to vector<8x512xf32>
    %c0_8 = arith.constant 0 : index
    %c0_9 = arith.constant 0 : index
    %11 = vector.load %arg2[%c0_8, %c0_9] : memref<8x1xi32, #tpu.memory_space<vmem>>, vector<8x1xi32>
    %c0_10 = arith.constant 0 : index
    %12 = memref.load %arg1[%c0_10] : memref<1xi32, #tpu.memory_space<smem>>
    %c0_i32_11 = arith.constant 0 : i32
    %13 = arith.subi %12, %c0_i32_11 : i32
    %c1_i32 = arith.constant 1 : i32
    %c1_i32_12 = arith.constant 1 : i32
    %14 = arith.subi %c1_i32, %c1_i32_12 : i32
    %15 = arith.addi %13, %14 : i32
    %c1_i32_13 = arith.constant 1 : i32
    %16 = arith.divsi %15, %c1_i32_13 : i32
    %c1_i32_14 = arith.constant 1 : i32
    %c0_i32_15 = arith.constant 0 : i32
    %c0_i32_16 = arith.constant 0 : i32
    %17 = arith.subi %16, %c0_i32_16 : i32
    %18 = arith.addi %c0_i32_16, %17 : i32
    %c1_i32_17 = arith.constant 1 : i32
    scf.for %arg14 = %c0_i32_16 to %18 step %c1_i32_17  : i32 {
      %25 = arith.muli %arg14, %c1_i32_14 : i32
      %26 = arith.addi %c0_i32_15, %25 : i32
      %27 = arith.index_cast %26 : i32 to index
      %c0_22 = arith.constant 0 : index
      %c0_23 = arith.constant 0 : index
      %28 = vector.load %arg11[%27, %c0_22, %c0_23] : memref<8x8x128xf32, #tpu.memory_space<vmem>>, vector<1x8x128xf32>
      %29 = vector.shape_cast %28 : vector<1x8x128xf32> to vector<8x128xf32>
      %c0_24 = arith.constant 0 : index
      %c0_25 = arith.constant 0 : index
      %30 = vector.load %arg12[%c0_24, %c0_25] : memref<8x128xf32, #tpu.memory_space<vmem>>, vector<8x128xf32>
      %31 = tpu.concatenate %29, %30 in 1 : vector<8x128xf32>, vector<8x128xf32> -> vector<8x256xf32>
      %32 = arith.truncf %31 : vector<8x256xf32> to vector<8x256xbf16>
      %c0_26 = arith.constant 0 : index
      %c0_27 = arith.constant 0 : index
      %c0_28 = arith.constant 0 : index
      %33 = vector.load %arg4[%c0_26, %c0_27, %c0_28] : memref<1x256x512xbf16, #tpu.memory_space<vmem>>, vector<1x256x512xbf16>
      %34 = vector.shape_cast %33 : vector<1x256x512xbf16> to vector<256x512xbf16>
      %cst_29 = arith.constant dense<0.000000e+00> : vector<8x512xf32>
      %35 = tpu.matmul %32, %34, %cst_29 {dimension_numbers = #tpu.dot_dimension_numbers<[1], [0], [0], [1], [0, 0, 1, 1], [], []>} : vector<8x256xbf16>, vector<256x512xbf16>, vector<8x512xf32> -> vector<8x512xf32>
      %36 = arith.addf %35, %10 : vector<8x512xf32>
      %37 = vector.extract_strided_slice %36 {offsets = [0, 0], sizes = [8, 128], strides = [1, 1]} : vector<8x512xf32> to vector<8x128xf32>
      %38 = arith.negf %37 : vector<8x128xf32>
      %39 = math.exp %38 : vector<8x128xf32>
      %cst_30 = arith.constant 1.000000e+00 : f32
      %40 = vector.broadcast %cst_30 : f32 to vector<8x128xf32>
      %41 = arith.addf %40, %39 : vector<8x128xf32>
      %42 = arith.divf %40, %41 : vector<8x128xf32>
      %43 = vector.extract_strided_slice %36 {offsets = [0, 128], sizes = [8, 128], strides = [1, 1]} : vector<8x512xf32> to vector<8x128xf32>
      %44 = arith.negf %43 : vector<8x128xf32>
      %45 = math.exp %44 : vector<8x128xf32>
      %cst_31 = arith.constant 1.000000e+00 : f32
      %46 = vector.broadcast %cst_31 : f32 to vector<8x128xf32>
      %47 = arith.addf %46, %45 : vector<8x128xf32>
      %48 = arith.divf %46, %47 : vector<8x128xf32>
      %49 = vector.extract_strided_slice %36 {offsets = [0, 256], sizes = [8, 128], strides = [1, 1]} : vector<8x512xf32> to vector<8x128xf32>
      %50 = math.tanh %49 : vector<8x128xf32>
      %51 = vector.extract_strided_slice %36 {offsets = [0, 384], sizes = [8, 128], strides = [1, 1]} : vector<8x512xf32> to vector<8x128xf32>
      %52 = arith.negf %51 : vector<8x128xf32>
      %53 = math.exp %52 : vector<8x128xf32>
      %cst_32 = arith.constant 1.000000e+00 : f32
      %54 = vector.broadcast %cst_32 : f32 to vector<8x128xf32>
      %55 = arith.addf %54, %53 : vector<8x128xf32>
      %56 = arith.divf %54, %55 : vector<8x128xf32>
      %c0_33 = arith.constant 0 : index
      %c0_34 = arith.constant 0 : index
      %57 = vector.load %arg13[%c0_33, %c0_34] : memref<8x128xf32, #tpu.memory_space<vmem>>, vector<8x128xf32>
      %58 = arith.mulf %48, %57 : vector<8x128xf32>
      %59 = arith.mulf %42, %50 : vector<8x128xf32>
      %60 = arith.addf %58, %59 : vector<8x128xf32>
      %61 = math.tanh %60 : vector<8x128xf32>
      %62 = arith.mulf %56, %61 : vector<8x128xf32>
      %63 = vector.broadcast %26 : i32 to vector<8x1xi32>
      %64 = arith.cmpi slt, %63, %11 : vector<8x1xi32>
      %c0_35 = arith.constant 0 : index
      %c0_36 = arith.constant 0 : index
      %65 = vector.load %arg13[%c0_35, %c0_36] : memref<8x128xf32, #tpu.memory_space<vmem>>, vector<8x128xf32>
      %66 = vector.shape_cast %64 : vector<8x1xi1> to vector<8x1xi1>
      %67 = vector.broadcast %66 : vector<8x1xi1> to vector<8x128xi1>
      %68 = arith.select %67, %60, %65 : vector<8x128xi1>, vector<8x128xf32>
      %c0_37 = arith.constant 0 : index
      %c0_38 = arith.constant 0 : index
      %69 = vector.load %arg13[%c0_37, %c0_38] : memref<8x128xf32, #tpu.memory_space<vmem>>, vector<8x128xf32>
      tpu.vector_store %arg13[%c0_37, %c0_38], %68 {strides = array<i32>} : memref<8x128xf32, #tpu.memory_space<vmem>>, vector<8x128xf32>,
      %c0_39 = arith.constant 0 : index
      %c0_40 = arith.constant 0 : index
      %70 = vector.load %arg12[%c0_39, %c0_40] : memref<8x128xf32, #tpu.memory_space<vmem>>, vector<8x128xf32>
      %71 = vector.shape_cast %64 : vector<8x1xi1> to vector<8x1xi1>
      %72 = vector.broadcast %71 : vector<8x1xi1> to vector<8x128xi1>
      %73 = arith.select %72, %62, %70 : vector<8x128xi1>, vector<8x128xf32>
      %c0_41 = arith.constant 0 : index
      %c0_42 = arith.constant 0 : index
      %74 = vector.load %arg12[%c0_41, %c0_42] : memref<8x128xf32, #tpu.memory_space<vmem>>, vector<8x128xf32>
      tpu.vector_store %arg12[%c0_41, %c0_42], %73 {strides = array<i32>} : memref<8x128xf32, #tpu.memory_space<vmem>>, vector<8x128xf32>,
      %c0_43 = arith.constant 0 : index
      %c0_44 = arith.constant 0 : index
      %75 = vector.load %arg12[%c0_43, %c0_44] : memref<8x128xf32, #tpu.memory_space<vmem>>, vector<8x128xf32>
      %76 = arith.index_cast %26 : i32 to index
      %c0_45 = arith.constant 0 : index
      %c0_46 = arith.constant 0 : index
      %77 = vector.load %arg11[%76, %c0_45, %c0_46] : memref<8x8x128xf32, #tpu.memory_space<vmem>>, vector<1x8x128xf32>
      %78 = vector.shape_cast %77 : vector<1x8x128xf32> to vector<8x128xf32>
      %79 = vector.shape_cast %75 : vector<8x128xf32> to vector<1x8x128xf32>
      tpu.vector_store %arg11[%76, %c0_45, %c0_46], %79 {strides = array<i32>} : memref<8x8x128xf32, #tpu.memory_space<vmem>>, vector<1x8x128xf32>,
    }
    %c0_i32_18 = arith.constant 0 : i32
    %19 = arith.cmpi eq, %arg0, %c0_i32_18 : i32
    %20 = arith.extui %19 : i1 to i32
    %c0_i32_19 = arith.constant 0 : i32
    %21 = arith.cmpi ne, %20, %c0_i32_19 : i32
    scf.if %21 {
      %c0_22 = arith.constant 0 : index
      %c0_23 = arith.constant 0 : index
      %25 = vector.load %arg12[%c0_22, %c0_23] : memref<8x128xf32, #tpu.memory_space<vmem>>, vector<8x128xf32>
      %c0_24 = arith.constant 0 : index
      %c0_25 = arith.constant 0 : index
      %26 = vector.load %arg9[%c0_24, %c0_25] : memref<8x256xf32, #tpu.memory_space<vmem>>, vector<8x128xf32>
      tpu.vector_store %arg9[%c0_24, %c0_25], %25 {strides = array<i32>} : memref<8x256xf32, #tpu.memory_space<vmem>>, vector<8x128xf32>,
    } else {
    }
    %c1_i32_20 = arith.constant 1 : i32
    %22 = arith.cmpi eq, %arg0, %c1_i32_20 : i32
    %23 = arith.extui %22 : i1 to i32
    %c0_i32_21 = arith.constant 0 : i32
    %24 = arith.cmpi ne, %23, %c0_i32_21 : i32
    scf.if %24 {
      %c0_22 = arith.constant 0 : index
      %c0_23 = arith.constant 0 : index
      %25 = vector.load %arg12[%c0_22, %c0_23] : memref<8x128xf32, #tpu.memory_space<vmem>>, vector<8x128xf32>
      %c0_24 = arith.constant 0 : index
      %c128 = arith.constant 128 : index
      %26 = vector.load %arg9[%c0_24, %c128] : memref<8x256xf32, #tpu.memory_space<vmem>>, vector<8x128xf32>
      tpu.vector_store %arg9[%c0_24, %c128], %25 {strides = array<i32>} : memref<8x256xf32, #tpu.memory_space<vmem>>, vector<8x128xf32>,
      %c0_25 = arith.constant 0 : index
      %c0_26 = arith.constant 0 : index
      %c0_27 = arith.constant 0 : index
      %27 = vector.load %arg11[%c0_25, %c0_26, %c0_27] : memref<8x8x128xf32, #tpu.memory_space<vmem>>, vector<8x8x128xf32>
      %c0_28 = arith.constant 0 : index
      %c0_29 = arith.constant 0 : index
      %c0_30 = arith.constant 0 : index
      %28 = vector.load %arg10[%c0_28, %c0_29, %c0_30] : memref<8x8x128xf32, #tpu.memory_space<vmem>>, vector<8x8x128xf32>
      tpu.vector_store %arg10[%c0_28, %c0_29, %c0_30], %27 {strides = array<i32>} : memref<8x8x128xf32, #tpu.memory_space<vmem>>, vector<8x8x128xf32>,
      %c0_31 = arith.constant 0 : index
      %c0_32 = arith.constant 0 : index
      %29 = vector.load %arg9[%c0_31, %c0_32] : memref<8x256xf32, #tpu.memory_space<vmem>>, vector<8x256xf32>
      %c0_33 = arith.constant 0 : index
      %c0_34 = arith.constant 0 : index
      %30 = vector.load %arg6[%c0_33, %c0_34] : memref<256x128xf32, #tpu.memory_space<vmem>>, vector<256x128xf32>
      %cst_35 = arith.constant dense<0.000000e+00> : vector<8x128xf32>
      %31 = tpu.matmul %29, %30, %cst_35 {dimension_numbers = #tpu.dot_dimension_numbers<[1], [0], [0], [1], [0, 0, 1, 1], [], []>} : vector<8x256xf32>, vector<256x128xf32>, vector<8x128xf32> -> vector<8x128xf32>
      %c0_36 = arith.constant 0 : index
      %c0_37 = arith.constant 0 : index
      %32 = vector.load %arg7[%c0_36, %c0_37] : memref<1x128xf32, #tpu.memory_space<vmem>>, vector<1x128xf32>
      %33 = vector.broadcast %32 : vector<1x128xf32> to vector<8x128xf32>
      %34 = arith.addf %31, %33 : vector<8x128xf32>
      %35 = tpu.iota {dimensions = array<i32: 1>} : vector<8x128xi32>
      %c3_i32 = arith.constant 3 : i32
      %36 = vector.broadcast %c3_i32 : i32 to vector<8x128xi32>
      %37 = arith.cmpi slt, %35, %36 : vector<8x128xi32>
      %cst_38 = arith.constant -1.000000e+30 : f32
      %38 = vector.broadcast %cst_38 : f32 to vector<8x128xf32>
      %39 = arith.select %37, %34, %38 : vector<8x128xi1>, vector<8x128xf32>
      %cst_39 = arith.constant dense<0xFF800000> : vector<8xf32>
      %40 = vector.multi_reduction <maximumf>, %39, %cst_39 [1] : vector<8x128xf32> to vector<8xf32>
      %41 = vector.shape_cast %40 : vector<8xf32> to vector<8x1xf32>
      %42 = vector.broadcast %41 : vector<8x1xf32> to vector<8x128xf32>
      %43 = arith.subf %39, %42 : vector<8x128xf32>
      %44 = math.exp %43 : vector<8x128xf32>
      %cst_40 = arith.constant dense<0.000000e+00> : vector<8xf32>
      %45 = vector.multi_reduction <add>, %44, %cst_40 [1] : vector<8x128xf32> to vector<8xf32>
      %46 = vector.shape_cast %45 : vector<8xf32> to vector<8x1xf32>
      %47 = math.log %46 : vector<8x1xf32>
      %48 = arith.addf %41, %47 : vector<8x1xf32>
      %49 = vector.broadcast %48 : vector<8x1xf32> to vector<8x128xf32>
      %50 = arith.subf %39, %49 : vector<8x128xf32>
      %c0_41 = arith.constant 0 : index
      %c0_42 = arith.constant 0 : index
      %51 = vector.load %arg8[%c0_41, %c0_42] : memref<8x128xf32, #tpu.memory_space<vmem>>, vector<8x128xf32>
      tpu.vector_store %arg8[%c0_41, %c0_42], %50 {strides = array<i32>} : memref<8x128xf32, #tpu.memory_space<vmem>>, vector<8x128xf32>,
    } else {
    }
    return
  }
  func.func @transform_0(%arg0: i32, %arg1: memref<1xi32, #tpu.memory_space<smem>>) -> (i32, i32) {
    %c0_i32 = arith.constant 0 : i32
    %c0_i32_0 = arith.constant 0 : i32
    %c0_i32_1 = arith.constant 0 : i32
    return %c0_i32, %c0_i32_0 : i32, i32
  }
  func.func @transform_1(%arg0: i32, %arg1: memref<1xi32, #tpu.memory_space<smem>>) -> (i32, i32, i32) {
    %c0_i32 = arith.constant 0 : i32
    %c0_i32_0 = arith.constant 0 : i32
    %c0_i32_1 = arith.constant 0 : i32
    %c0_i32_2 = arith.constant 0 : i32
    return %c0_i32, %c0_i32_0, %c0_i32_1 : i32, i32, i32
  }
  func.func @transform_2(%arg0: i32, %arg1: memref<1xi32, #tpu.memory_space<smem>>) -> (i32, i32, i32) {
    %c0_i32 = arith.constant 0 : i32
    %c0_i32_0 = arith.constant 0 : i32
    %c0_i32_1 = arith.constant 0 : i32
    return %arg0, %c0_i32, %c0_i32_0 : i32, i32, i32
  }
  func.func @transform_3(%arg0: i32, %arg1: memref<1xi32, #tpu.memory_space<smem>>) -> (i32, i32, i32) {
    %c0_i32 = arith.constant 0 : i32
    %c0_i32_0 = arith.constant 0 : i32
    %c0_i32_1 = arith.constant 0 : i32
    return %arg0, %c0_i32, %c0_i32_0 : i32, i32, i32
  }
  func.func @transform_4(%arg0: i32, %arg1: memref<1xi32, #tpu.memory_space<smem>>) -> (i32, i32) {
    %c0_i32 = arith.constant 0 : i32
    %c0_i32_0 = arith.constant 0 : i32
    %c0_i32_1 = arith.constant 0 : i32
    return %c0_i32, %c0_i32_0 : i32, i32
  }
  func.func @transform_5(%arg0: i32, %arg1: memref<1xi32, #tpu.memory_space<smem>>) -> (i32, i32) {
    %c0_i32 = arith.constant 0 : i32
    %c0_i32_0 = arith.constant 0 : i32
    %c0_i32_1 = arith.constant 0 : i32
    return %c0_i32, %c0_i32_0 : i32, i32
  }
  func.func @transform_6(%arg0: i32, %arg1: memref<1xi32, #tpu.memory_space<smem>>) -> (i32, i32) {
    %c0_i32 = arith.constant 0 : i32
    %c0_i32_0 = arith.constant 0 : i32
    %c0_i32_1 = arith.constant 0 : i32
    return %c0_i32, %c0_i32_0 : i32, i32
  }
  func.func @transform_7(%arg0: i32, %arg1: memref<1xi32, #tpu.memory_space<smem>>) -> (i32, i32) {
    %c0_i32 = arith.constant 0 : i32
    %c0_i32_0 = arith.constant 0 : i32
    %c0_i32_1 = arith.constant 0 : i32
    return %c0_i32, %c0_i32_0 : i32, i32
  }
  func.func @transform_8(%arg0: i32, %arg1: memref<1xi32, #tpu.memory_space<smem>>) -> (i32, i32, i32) {
    %c0_i32 = arith.constant 0 : i32
    %c0_i32_0 = arith.constant 0 : i32
    %c0_i32_1 = arith.constant 0 : i32
    %c0_i32_2 = arith.constant 0 : i32
    return %c0_i32, %c0_i32_0, %c0_i32_1 : i32, i32, i32
  }
}

</mosaic_0001>

<bundles_post_ra>
// kernel: tpu_custom_call.1
= control target key start
LH: loop header
LB: loop body
LE: loop exit
PB: predicated region body
PF: predicated region fallthrough
CT: control target
= control target key end

     0   :  { %s2245_s0 = inlined_call_operand.<no memory space> [shape: s32[1], index: 0, kind: input, shape index: {}]   ;;  %s2246_s1 = inlined_call_operand.vmem [shape: s32[8,1], index: 1, kind: input, shape index: {}]   ;;  %s2247_s2 = inlined_call_operand.hbm [shape: f32[8,8,128], index: 2, kind: input, shape index: {}]   ;;  %s2248_s3 = inlined_call_operand.hbm [shape: bf16[2,256,512], index: 3, kind: input, shape index: {}]   ;;  %s2249_s4 = inlined_call_operand.vmem [shape: f32[2,1,512], index: 4, kind: input, shape index: {}]   ;;  %s2250_s5 = inlined_call_operand.hbm [shape: f32[256,128], index: 5, kind: input, shape index: {}]   ;;  %s2251_s6 = inlined_call_operand.vmem [shape: f32[1,128], index: 6, kind: input, shape index: {}]   ;;  %s2252_s7 = inlined_call_operand.hbm [shape: f32[8,128], index: 7, kind: output, shape index: {0}]   ;;  %s2253_s8 = inlined_call_operand.hbm [shape: f32[8,256], index: 8, kind: output, shape index: {1}]   ;;  %s2254_s9 = inlined_call_operand.hbm [shape: f32[8,8,128], index: 9, kind: output, shape index: {2}]  }
   0x1   :  { %15 = sst [smem:[#allocation6]] %s2245_s0 }
   0x2   :  { %16 = vsyncpa [#allocation8], 0 }
   0x3   :  { %17 = vsyncpa [#allocation11], 0 }
   0x4   :  { %19 = vsyncpa [#allocation11 + $0x1], 0 }
   0x5   :  { %20 = vsyncpa [#allocation9], 0 }
   0x6   :  { %21 = vsyncpa [#allocation15], 0  ;;  %s1882_s11 = smov 0   ;;  %s1884_s12 = smov 0  }
   0x7   :  { %s1886_s13 = smov 0   ;;  %s1888_s14 = smov 0  }
   0x8 LB: > { %s1901_s0 = sadd.s32 4294967295, %s1809_s14   ;;  %s1904_s15 = sadd.s32 1, %s1809_s14   ;;  %s1809_s14 = sphi %s1888_s14, %s2278_s14   ;;  %s1805_s13 = sphi %s1886_s13, %s2282_s13   ;;  %s1801_s12 = sphi %s1884_s12, %s2281_s12   ;;  %s1797_s11 = sphi %s1882_s11, %s2280_s11  }
   0x9   : > { %2261 = sst [smem:[#allocation22_spill]] %s1904_s15  ;;  %s73_s16 = ssub.s32 %s1809_s14, %s1904_s15 }
   0xa   : > { %s76_s17 = sadd.s32 1, %s1805_s13  ;;  %p74_p0 = scmp.eq.s32.totalorder %s73_s16, 0 }
   0xb   : > { %p83_p1 = scmp.ne.s32.totalorder %s1805_s13, %s1801_s12  ;;  %p84_p2 = scmp.eq.s32.totalorder %s1809_s14, 0 }
   0xc   : > { %p89_p3 = scmp.ne.s32.totalorder %s1801_s12, %s1797_s11  ;;  %p2255_p5 = scmp.eq.s32.totalorder %s1901_s0, 0 }
   0xd   : > { %s1914_s18 = scalar_select %p74_p0, %s1805_s13, %s76_s17  }
   0xe   : > { %p1916_p4 = por %p84_p2, %p83_p1  ;;  %p1216_p6 = scmp.ge.s32.totalorder %s1809_s14, 1 }
   0xf   : > { %2262 = sst [smem:[#allocation23_spill]] %s1914_s18  ;;  %p231_p7 = scmp.lt.s32.totalorder %s1809_s14, 3 }
  0x10   : > { %p1925_p8 = por %p2255_p5, %p89_p3  ;;  %s1815_s22 = smov [#allocation12]  }
  0x11   : > { %p1930_p10 = pnand %p1216_p6, %p231_p7  ;;  %s259_s23 = sshll.u32 %s1815_s22, 4  ;;  %s260_s23 = int_to_ptr.vmem [resolvable:$true] %s259_s23 }
  0x12   : > { %s2264_s20 = scalar_select %p1925_p8, 1, 0 }
  0x13   : > { %s2265_s21 = scalar_select %p1930_p10, 1, 0 }
  0x14   : > { %p1399_p11 = pneg %p1930_p10  ;;  %p1412_p13 = scmp.lt.s32.totalorder %s1809_s14, 2 }
  0x15   : > { %s1591_s29 = scalar_lea.hbm %s2250_s5, 4096 }
  0x16   : > { %p1938_p12 = pnand %p1399_p11, %p2255_p5  ;;  %p1946_p0 = pnand %p1412_p13, %p1916_p4 }
  0x17   : > { %p1592_p1 = scmp.ne.s32.totalorder %s2250_s5, %s1591_s29  ;;  %p1598_p4 = scmp.lt.u32.totalorder %s1591_s29, %s2250_s5 }
  0x18   : > { %s2267_s26 = scalar_select %p1946_p0, 1, 0 }
  0x19   : > { %p1593_p2 = pneg %p1938_p12 }
  0x1b   : > { %p1594_p3 = pnand %p1593_p2, %p1592_p1 }
  0x1d   : > { %p1595_p6 = pneg %p1594_p3 }
  0x1f   : > { %p1600_p7 = pnand %p1598_p4, %p1595_p6 }
  0x21   : > { %1603 = shalt.err (!%p1600_p7)
}
  0x22   : > { %s1604_s17 = scalar_lea.vmem %s260_s23, 4096  ;;  %p1612_p5 = scmp.lt.s32.totalorder %s260_s23, %s260_s23 }
  0x23   : > { %p1605_p11 = scmp.ne.s32.totalorder %s260_s23, %s1604_s17  ;;  %p1613_p8 = scmp.lt.s32.totalorder %s1604_s17, %s1604_s17 }
  0x25   : > { %p1607_p13 = pnand %p1605_p11, %p1593_p2  ;;  %p1614_p10 = por %p1613_p8, %p1612_p5 }
  0x27   : > { %p1608_p9 = pneg %p1607_p13 }
  0x29   : > { %p1615_p0 = pnand %p1614_p10, %p1608_p9 }
  0x2b   : > { %1618 = shalt.err (!%p1615_p0)
}
  0x2c   : > { %s1816_s19 = smov 128   ;;  %s1817_s22 = smov 8  }
  0x2d   : > { %1405 = dma.hbm_to_vmem [thread:$0]  (!%p1938_p12), %s2250_s5, 4096, %s260_s23, [#allocation11], %s1816_s19, %s1816_s19, %s1817_s22  }
  0x2e   : > { %s1818_s29 = smov [#allocation7]   ;;  %s1619_s16 = scalar_lea.hbm %s2247_s2, 1024 }
  0x2f   : > { %s246_s30 = sshll.u32 %s1818_s29, 4  ;;  %p1620_p5 = scmp.ne.s32.totalorder %s2247_s2, %s1619_s16  ;;  %s247_s30 = int_to_ptr.vmem [resolvable:$true] %s246_s30 }
  0x30   : > { %p1626_p10 = scmp.lt.u32.totalorder %s1619_s16, %s2247_s2 }
  0x31   : > { %p1622_p8 = pnand %p1620_p5, %p1593_p2 }
  0x33   : > { %p1623_p9 = pneg %p1622_p8 }
  0x35   : > { %p1628_p0 = pnand %p1626_p10, %p1623_p9 }
  0x37   : > { %1631 = shalt.err (!%p1628_p0)
}
  0x38   : > { %s1632_s23 = scalar_lea.vmem %s247_s30, 1024  ;;  %p1640_p4 = scmp.lt.s32.totalorder %s247_s30, %s247_s30 }
  0x39   : > { %p1633_p1 = scmp.ne.s32.totalorder %s247_s30, %s1632_s23  ;;  %p1641_p7 = scmp.lt.s32.totalorder %s1632_s23, %s1632_s23 }
  0x3b   : > { %p1635_p3 = pnand %p1633_p1, %p1593_p2  ;;  %p1642_p11 = por %p1641_p7, %p1640_p4 }
  0x3d   : > { %p1636_p6 = pneg %p1635_p3 }
  0x3f   : > { %p1643_p13 = pnand %p1642_p11, %p1636_p6 }
  0x41   : > { %1646 = shalt.err (!%p1643_p13)
}
  0x42   : > { %1402 = dma.hbm_to_vmem [thread:$0]  (!%p1938_p12), %s2247_s2, 1024, %s247_s30, [#allocation8], %s1816_s19, %s1816_s19, %s1817_s22  }
  0x43   : > { %s278_s15 = sand.u32 1, %s1805_s13   ;;  %s1309_s18 = sshll.u32 %s1809_s14, 13 }
  0x44   : > { %s1220_s28 = sshll.u32 %s278_s15, 9  ;;  %s1997_s11 = scalar_lea.hbm %s2248_s3, %s1309_s18 }
  0x45   : > { %s280_s24 = scalar_lea.vmem [#allocation10], %s1220_s28  ;;  %s2268_s17 = sand.u32 1, %s1809_s14  }
  0x46   : > { %s287_s16 = sshll.u32 %s280_s24, 4  ;;  %s2003_s23 = scalar_lea.sflag [#allocation11], %s2268_s17  ;;  %s1999_s16 = int_to_ptr.vmem [resolvable:$true] %s287_s16 }
  0x47   : > { %s1647_s19 = scalar_lea.hbm %s1997_s11, 8192  ;;  %p2269_p2 = scmp.ne.s32.totalorder %s2267_s26, 0 }
  0x48   : > { %p1648_p12 = scmp.ne.s32.totalorder %s1997_s11, %s1647_s19  ;;  %s1652_s25 = scalar_lea.hbm %s2248_s3, 16384 }
  0x49   : > { %p1649_p5 = pneg %p2269_p2  ;;  %p1653_p10 = scmp.lt.u32.totalorder %s1997_s11, %s2248_s3 }
  0x4a   : > { %p1654_p0 = scmp.lt.u32.totalorder %s1652_s25, %s1647_s19  ;;  %p1656_p3 = scmp.lt.u32.totalorder %s1647_s19, %s1997_s11 }
  0x4b   : > { %p1650_p8 = pnand %p1649_p5, %p1648_p12 }
  0x4c   : > { %p1655_p1 = por %p1654_p0, %p1653_p10 }
  0x4d   : > { %p1651_p9 = pneg %p1650_p8 }
  0x4e   : > { %p1657_p6 = por %p1656_p3, %p1655_p1 }
  0x50   : > { %p1658_p4 = pnand %p1657_p6, %p1651_p9 }
  0x52   : > { %1661 = shalt.err (!%p1658_p4)
}
  0x53   : > { %s1662_s14 = scalar_lea.vmem %s1999_s16, 8192  ;;  %s1819_s18 = smov [#allocation10]  }
  0x54   : > { %p1663_p7 = scmp.ne.s32.totalorder %s1999_s16, %s1662_s14  ;;  %s1667_s28 = sshll.u32 %s1819_s18, 4  ;;  %s1668_s28 = int_to_ptr.vmem [resolvable:$false] %s1667_s28 }
  0x55   : > { %s1669_s29 = scalar_lea.vmem %s1668_s28, 16384  ;;  %p1670_p12 = scmp.lt.s32.totalorder %s1999_s16, %s1668_s28 }
  0x56   : > { %p1665_p11 = pnand %p1663_p7, %p1649_p5  ;;  %p1671_p8 = scmp.lt.s32.totalorder %s1669_s29, %s1662_s14 }
  0x58   : > { %p1666_p13 = pneg %p1665_p11  ;;  %p1672_p10 = por %p1671_p8, %p1670_p12 }
  0x5a   : > { %p1673_p0 = pnand %p1672_p10, %p1666_p13 }
  0x5c   : > { %1676 = shalt.err (!%p1673_p0)
}
  0x5d   : > { %s1820_s10 = smov 256   ;;  %s1821_s24 = smov 16  }
  0x5e   : > { %1409 = dma.hbm_to_vmem [thread:$0]  (!%p2269_p2), %s1997_s11, 8192, %s1999_s16, %s2003_s23, %s1820_s10, %s1820_s10, %s1821_s24  }
  0x5f   : > { %p2270_p5 = scmp.ne.s32.totalorder %s2265_s21, 0 }
  0x60   : > { %p2271_p9 = scmp.eq.s32.totalorder (!%p2270_p5), %s1901_s0, 0 }
  0x61   : > { %306 = sbr.rel (%p2270_p5) target bundleno = 1118 (0x45e), region = 44 }
  0x68   : > { %1776 = dma.done.wait (%p2271_p9), [#allocation8], 1024   ;;  %p2272_p1 = pmov %p2271_p9 }
  0x69   : > { %s312_s17 = sand.u32 1, %s1901_s0   ;;  %s314_s19 = sand.u32 1, %s1801_s12  }
  0x6a   : > { %1778 = vsyncadd (%p2272_p1), [#allocation8], 4294966272  ;;  %s1225_s22 = sshll.u32 %s314_s19, 9  ;;  %s313_s30 = scalar_lea.sflag [#allocation11], %s312_s17 }
  0x6b   : > { %s2039_s25 = scalar_lea.vmem [#allocation10], %s1225_s22  ;;  %p2273_p3 = scmp.ne.s32.totalorder %s2264_s20, 0 }
  0x6d   : > { %1780 = dma.done.wait (%p2273_p3), %s313_s30, 8192  }
  0x6e   : > { %1782 = vsyncadd (%p2273_p3), %s313_s30, 4294959104  ;;  %p2274_p2 = pmov %p2272_p1 }
  0x6f   : > { %p2275_p6 = pmov %p2272_p1 }
  0x70   : > { %1784 = dma.done.wait (%p2274_p2), [#allocation11], 4096  }
  0x71   : > { %1786 = vsyncadd (%p2275_p6), [#allocation11], 4294963200  ;;  %p352_p4 = scmp.lt.s32.totalorder %s1901_s0, 1  ;;  %p2276_p7 = scmp.ne.s32.totalorder %s1901_s0, 0 }
  0x72   : > { %v360_v0 = vld [vmem:[#allocation7] sm:$0xff] (!%p2276_p7)  ;;  %v361_v1 = vld [vmem:[#allocation7 + $0x8] sm:$0xff] (!%p2276_p7)  ;;  %v362_v2 = vld [vmem:[#allocation7 + $0x10] sm:$0xff] (!%p2276_p7) }
  0x73   : > { %s353_s21 = scalar_select %p352_p4, %s1901_s0, 1 }
  0x74   : > { %359 = sbr.rel (%p2276_p7) target bundleno = 123 (0x7b), region = 60  ;;  %368 = vst [vmem:[#allocation2] sm:$0xff] (!%p2276_p7), %v360_v0  ;;  %369 = vst [vmem:[#allocation2 + $0x8] sm:$0xff] (!%p2276_p7), %v361_v1  ;;  %v363_v3 = vld [vmem:[#allocation7 + $0x18] sm:$0xff] (!%p2276_p7)  ;;  %v364_v4 = vld [vmem:[#allocation7 + $0x20] sm:$0xff] (!%p2276_p7) }
  0x75   : > { %s1227_s26 = sshll.u32 %s353_s21, 2  ;;  %370 = vst [vmem:[#allocation2 + $0x10] sm:$0xff] (!%p2276_p7), %v362_v2  ;;  %v365_v5 = vld [vmem:[#allocation7 + $0x28] sm:$0xff] (!%p2276_p7)  ;;  %371 = vst [vmem:[#allocation2 + $0x18] sm:$0xff] (!%p2276_p7), %v363_v3  ;;  %v366_v6 = vld [vmem:[#allocation7 + $0x30] sm:$0xff] (!%p2276_p7) }
  0x76   : > { %s355_s23 = scalar_lea.vmem %s2249_s4, %s1227_s26  ;;  %372 = vst [vmem:[#allocation2 + $0x20] sm:$0xff] (!%p2276_p7), %v364_v4  ;;  %373 = vst [vmem:[#allocation2 + $0x28] sm:$0xff] (!%p2276_p7), %v365_v5  ;;  %v367_v7 = vld [vmem:[#allocation7 + $0x38] sm:$0xff] (!%p2276_p7) }
  0x77   : > { %374 = vst [vmem:[#allocation2 + $0x30] sm:$0xff] (!%p2276_p7), %v366_v6  ;;  %375 = vst [vmem:[#allocation2 + $0x38] sm:$0xff] (!%p2276_p7), %v367_v7 }
  0x7b PF: > { %v380_v8 = vlaneseq  ;;  %v2059_v9 = vld [vmem:[%s2246_s1] sm:$0xff]  ;;  %s2061_s15 = sld [smem:[#allocation6]]  ;;  %v1822_v10 = vmov 0.0  }
  0x7c   : > { %376 = vst [vmem:[#allocation3] sm:$0xff] %v1822_v10  ;;  %377 = vst [vmem:[#allocation4] sm:$0xff] %v1822_v10  ;;  %v378_v12 = vld [vmem:[%s355_s23] sm:$0xf] }
  0x7d   : > { %v381_v11 = vshrl.u32 %v380_v8, 7 }
  0x7f   : > { %v382_v13 = vsub.s32 0, %v381_v11  ;;  %v386_v14 = vsub.s32 1, %v381_v11  ;;  %v390_v15 = vsub.s32 2, %v381_v11  ;;  %v394_v16 = vsub.s32 3, %v381_v11 }
  0x81   : > { %v2064_v17 = vrot.slane %v378_v12, %v382_v13  ;;  %v2066_v18 = vrot.slane %v378_v12, %v386_v14  ;;  %v2068_v19 = vrot.slane %v378_v12, %v390_v15  ;;  %v2070_v20 = vrot.slane %v378_v12, %v394_v16  ;;  %p1229_p11 = scmp.le.s32.totalorder %s2061_s15, 0 }
  0x82   : > { %s2073_s14 = smov (!%p1229_p11), 0  }
  0x83   : > { %1156 = sbr.rel (%p1229_p11) target bundleno = 463 (0x1cf), region = 123 }
  0x8a LB: >> { %v1475_v21 = vld [vmem:[%s2039_s25 + $0x4] ss:$16 sps:$4 sm:$0xff]   ;;  %v1477_v22 = vld [vmem:[%s2039_s25] ss:$16 sps:$4 sm:$0xff]   ;;  %v1823_v23 = vmov 0   ;;  %v905_v25 = vstv %s1813_s14  ;;  %s1230_s18 = sshll.u32 %s1813_s14, 3  ;;  %s1813_s14 = sphi %s2073_s14, %s405_s14  }
  0x8b   : >> { %1474 = vset.pattern.permute.xlu0 %v1823_v23  ;;  %798 = vmatprep.subr.bf16.mxu0 %v1475_v21  ;;  %v1478_v24 = vld [vmem:[%s2039_s25 + $0x24] ss:$16 sps:$4 sm:$0xff]   ;;  %v1480_v26 = vld [vmem:[%s2039_s25 + $0x20] ss:$16 sps:$4 sm:$0xff]   ;;  %vm906_vm0 = vcmp.lt.s32.totalorder %v905_v25, %v2059_v9  ;;  %v1486_v29 = vld [vmem:[%s2039_s25 + $0xc] ss:$16 sps:$4 sm:$0xff]  }
  0x8c   : >> { %799 = vmatpush1.bf16.msra.mxu0 %v1477_v22  ;;  %v1481_v27 = vld [vmem:[%s2039_s25 + $0x44] ss:$16 sps:$4 sm:$0xff]   ;;  %v907_v28 = vsel %vm906_vm0, 1, %v1823_v23  ;;  %v1489_v30 = vld [vmem:[%s2039_s25 + $0x8] ss:$16 sps:$4 sm:$0xff]   ;;  %839 = vmatprep.subr.bf16.mxu1 %v1486_v29  ;;  %s2146_s28 = scalar_lea.vmem [#allocation2], %s1230_s18 }
  0x8d   : >> { %800 = vmatprep.subr.bf16.mxu0 %v1478_v24  ;;  %909 = vperm.xlu0 %1474, %v907_v28   ;;  %v1483_v31 = vld [vmem:[%s2039_s25 + $0x40] ss:$16 sps:$4 sm:$0xff]   ;;  %v1484_v32 = vld [vmem:[%s2039_s25 + $0x64] ss:$16 sps:$4 sm:$0xff]   ;;  %v1492_v33 = vld [vmem:[%s2039_s25 + $0x2c] ss:$16 sps:$4 sm:$0xff]  }
  0x8e   : >> { %840 = vmatpush1.bf16.msra.mxu1 %v1489_v30  ;;  %v1495_v34 = vld [vmem:[%s2039_s25 + $0x28] ss:$16 sps:$4 sm:$0xff]   ;;  %v1488_v35 = vld [vmem:[%s2039_s25 + $0x60] ss:$16 sps:$4 sm:$0xff]   ;;  %v1490_v36 = vld [vmem:[%s2039_s25 + $0x84] ss:$16 sps:$4 sm:$0xff]  }
  0x8f   : >> { %841 = vmatprep.subr.bf16.mxu1 %v1492_v33  ;;  %v1498_v37 = vld [vmem:[%s2039_s25 + $0x4c] ss:$16 sps:$4 sm:$0xff]   ;;  %v1501_v38 = vld [vmem:[%s2039_s25 + $0x48] ss:$16 sps:$4 sm:$0xff]   ;;  %v1494_v40 = vld [vmem:[%s2039_s25 + $0x80] ss:$16 sps:$4 sm:$0xff]  }
  0x90   : >> { %801 = vmatpush1.bf16.msra.mxu0 %v1480_v26  ;;  %v1504_v39 = vld [vmem:[%s2039_s25 + $0x6c] ss:$16 sps:$4 sm:$0xff]   ;;  %v1496_v41 = vld [vmem:[%s2039_s25 + $0xa4] ss:$16 sps:$4 sm:$0xff]   ;;  %v1507_v42 = vld [vmem:[%s2039_s25 + $0x68] ss:$16 sps:$4 sm:$0xff]  }
  0x91   : >> { %802 = vmatprep.subr.bf16.mxu0 %v1481_v27  ;;  %v1510_v43 = vld [vmem:[%s2039_s25 + $0x8c] ss:$16 sps:$4 sm:$0xff]   ;;  %v1500_v44 = vld [vmem:[%s2039_s25 + $0xa0] ss:$16 sps:$4 sm:$0xff]   ;;  %v1502_v45 = vld [vmem:[%s2039_s25 + $0xc4] ss:$16 sps:$4 sm:$0xff]  }
  0x92   : >> { %842 = vmatpush1.bf16.msra.mxu1 %v1495_v34  ;;  %v1513_v46 = vld [vmem:[%s2039_s25 + $0x88] ss:$16 sps:$4 sm:$0xff]   ;;  %v1516_v47 = vld [vmem:[%s2039_s25 + $0xac] ss:$16 sps:$4 sm:$0xff]   ;;  %v1506_v48 = vld [vmem:[%s2039_s25 + $0xc0] ss:$16 sps:$4 sm:$0xff]  }
  0x93   : >> { %843 = vmatprep.subr.bf16.mxu1 %v1498_v37  ;;  %v1508_v49 = vld [vmem:[%s2039_s25 + $0xe4] ss:$16 sps:$4 sm:$0xff]   ;;  %v1519_v50 = vld [vmem:[%s2039_s25 + $0xa8] ss:$16 sps:$4 sm:$0xff]   ;;  %v1522_v51 = vld [vmem:[%s2039_s25 + $0xcc] ss:$16 sps:$4 sm:$0xff]  }
  0x94   : >> { %803 = vmatpush1.bf16.msra.mxu0 %v1483_v31  ;;  %v1512_v52 = vld [vmem:[%s2039_s25 + $0xe0] ss:$16 sps:$4 sm:$0xff]   ;;  %v1514_v53 = vld [vmem:[%s2039_s25 + $0x104] ss:$16 sps:$4 sm:$0xff]   ;;  %v1525_v54 = vld [vmem:[%s2039_s25 + $0xc8] ss:$16 sps:$4 sm:$0xff]  }
  0x95   : >> { %804 = vmatprep.subr.bf16.mxu0 %v1484_v32  ;;  %v1528_v55 = vld [vmem:[%s2039_s25 + $0xec] ss:$16 sps:$4 sm:$0xff]   ;;  %v1518_v56 = vld [vmem:[%s2039_s25 + $0x100] ss:$16 sps:$4 sm:$0xff]   ;;  %v1520_v57 = vld [vmem:[%s2039_s25 + $0x124] ss:$16 sps:$4 sm:$0xff]  }
  0x96   : >> { %844 = vmatpush1.bf16.msra.mxu1 %v1501_v38  ;;  %v1531_v58 = vld [vmem:[%s2039_s25 + $0xe8] ss:$16 sps:$4 sm:$0xff]   ;;  %v1534_v59 = vld [vmem:[%s2039_s25 + $0x10c] ss:$16 sps:$4 sm:$0xff]   ;;  %v1524_v60 = vld [vmem:[%s2039_s25 + $0x120] ss:$16 sps:$4 sm:$0xff]  }
  0x97   : >> { %845 = vmatprep.subr.bf16.mxu1 %v1504_v39  ;;  %v1526_v61 = vld [vmem:[%s2039_s25 + $0x144] ss:$16 sps:$4 sm:$0xff]   ;;  %v1537_v62 = vld [vmem:[%s2039_s25 + $0x108] ss:$16 sps:$4 sm:$0xff]   ;;  %v1540_v63 = vld [vmem:[%s2039_s25 + $0x12c] ss:$16 sps:$4 sm:$0xff]  }
  0x98   : >> { %805 = vmatpush1.bf16.msra.mxu0 %v1488_v35  ;;  %v2120_v0 = vld [vmem:[#allocation3] sm:$0xff]  ;;  %v1543_v4 = vld [vmem:[%s2039_s25 + $0x128] ss:$16 sps:$4 sm:$0xff]   ;;  %v1546_v5 = vld [vmem:[%s2039_s25 + $0x14c] ss:$16 sps:$4 sm:$0xff]   ;;  %s405_s14 = sadd.s32 1, %s1813_s14  }
  0x99   : >> { %806 = vmatprep.subr.bf16.mxu0 %v1490_v36  ;;  %v1530_v1 = vld [vmem:[%s2039_s25 + $0x140] ss:$16 sps:$4 sm:$0xff]   ;;  %v413_v2 = vpack.c.bf16 %v2120_v0, %v2120_v0  ;;  %v1532_v3 = vld [vmem:[%s2039_s25 + $0x164] ss:$16 sps:$4 sm:$0xff]   ;;  %v1549_v10 = vld [vmem:[%s2039_s25 + $0x148] ss:$16 sps:$4 sm:$0xff]   ;;  %p404_p13 = scmp.ge.s32.totalorder %s405_s14, %s2061_s15 }
  0x9a   : >> { %846 = vmatpush1.bf16.msra.mxu1 %v1507_v42  ;;  %v1536_v6 = vld [vmem:[%s2039_s25 + $0x160] ss:$16 sps:$4 sm:$0xff]   ;;  %v1538_v7 = vld [vmem:[%s2039_s25 + $0x184] ss:$16 sps:$4 sm:$0xff]   ;;  %v1552_v11 = vld [vmem:[%s2039_s25 + $0x16c] ss:$16 sps:$4 sm:$0xff]  }
  0x9b   : >> { %847 = vmatprep.subr.bf16.mxu1 %v1510_v43  ;;  %830 = vmatprep.mubr.bf16.mxu0 %v413_v2  ;;  %v1542_v12 = vld [vmem:[%s2039_s25 + $0x180] ss:$16 sps:$4 sm:$0xff]   ;;  %v1544_v13 = vld [vmem:[%s2039_s25 + $0x1a4] ss:$16 sps:$4 sm:$0xff]   ;;  %v1555_v14 = vld [vmem:[%s2039_s25 + $0x168] ss:$16 sps:$4 sm:$0xff]  }
  0x9c   : >> { %807 = vmatpush1.bf16.msra.mxu0 %v1494_v40  ;;  %871 = vmatprep.mubr.bf16.mxu1 %v413_v2  ;;  %v1558_v15 = vld [vmem:[%s2039_s25 + $0x18c] ss:$16 sps:$4 sm:$0xff]   ;;  %v1548_v16 = vld [vmem:[%s2039_s25 + $0x1a0] ss:$16 sps:$4 sm:$0xff]   ;;  %v1550_v21 = vld [vmem:[%s2039_s25 + $0x1c4] ss:$16 sps:$4 sm:$0xff]  }
  0x9d   : >> { %808 = vmatprep.subr.bf16.mxu0 %v1496_v41  ;;  %v1561_v22 = vld [vmem:[%s2039_s25 + $0x188] ss:$16 sps:$4 sm:$0xff]   ;;  %v1562_v23 = vld [vmem:[%s2039_s25 + $0x1ac] ss:$16 sps:$4 sm:$0xff]   ;;  %v1554_v24 = vld [vmem:[%s2039_s25 + $0x1c0] ss:$16 sps:$4 sm:$0xff]  }
  0x9e   : >> { %848 = vmatpush1.bf16.msra.mxu1 %v1513_v46  ;;  %v1556_v25 = vld [vmem:[%s2039_s25 + $0x1e4] ss:$16 sps:$4 sm:$0xff]   ;;  %v1564_v26 = vld [vmem:[%s2039_s25 + $0x1a8] ss:$16 sps:$4 sm:$0xff]   ;;  %v1565_v27 = vld [vmem:[%s2039_s25 + $0x1cc] ss:$16 sps:$4 sm:$0xff]  }
  0x9f   : >> { %849 = vmatprep.subr.bf16.mxu1 %v1516_v47  ;;  %v1560_v28 = vld [vmem:[%s2039_s25 + $0x1e0] ss:$16 sps:$4 sm:$0xff]   ;;  %v1567_v30 = vld [vmem:[%s2039_s25 + $0x1c8] ss:$16 sps:$4 sm:$0xff]   ;;  %v1568_v31 = vld [vmem:[%s2039_s25 + $0x1ec] ss:$16 sps:$4 sm:$0xff]  }
  0xa0   : >> { %809 = vmatpush1.bf16.msra.mxu0 %v1500_v44  ;;  %v410_v29 = vld [vmem:[%s2146_s28] sm:$0xff]  ;;  %v1570_v33 = vld [vmem:[%s2039_s25 + $0x1e8] ss:$16 sps:$4 sm:$0xff]  }
  0xa1   : >> { %810 = vmatprep.subr.bf16.mxu0 %v1502_v45  ;;  %v412_v32 = vpack.c.bf16 %v410_v29, %v410_v29 }
  0xa2   : >> { %850 = vmatpush1.bf16.msra.mxu1 %v1519_v50 }
  0xa3   : >> { %851 = vmatprep.subr.bf16.mxu1 %v1522_v51 }
  0xa4   : >> { %811 = vmatpush1.bf16.msra.mxu0 %v1506_v48 }
  0xa5   : >> { %812 = vmatprep.subr.bf16.mxu0 %v1508_v49 }
  0xa6   : >> { %852 = vmatpush1.bf16.msra.mxu1 %v1525_v54 }
  0xa7   : >> { %853 = vmatprep.subr.bf16.mxu1 %v1528_v55  ;;  %v899_v55 = vld [vmem:[#allocation4] sm:$0xff] }
  0xa8   : >> { %813 = vmatpush1.bf16.msra.mxu0 %v1512_v52 }
  0xa9   : >> { %814 = vmatprep.subr.bf16.mxu0 %v1514_v53 }
  0xaa   : >> { %854 = vmatpush1.bf16.msra.mxu1 %v1531_v58 }
  0xab   : >> { %855 = vmatprep.subr.bf16.mxu1 %v1534_v59 }
  0xac   : >> { %815 = vmatpush1.bf16.msra.mxu0 %v1518_v56 }
  0xad   : >> { %816 = vmatprep.subr.bf16.mxu0 %v1520_v57 }
  0xae   : >> { %856 = vmatpush1.bf16.msra.mxu1 %v1537_v62 }
  0xaf   : >> { %857 = vmatprep.subr.bf16.mxu1 %v1540_v63 }
  0xb0   : >> { %817 = vmatpush1.bf16.msra.mxu0 %v1524_v60 }
  0xb1   : >> { %818 = vmatprep.subr.bf16.mxu0 %v1526_v61 }
  0xb2   : >> { %858 = vmatpush1.bf16.msra.mxu1 %v1543_v4 }
  0xb3   : >> { %859 = vmatprep.subr.bf16.mxu1 %v1546_v5 }
  0xb4   : >> { %819 = vmatpush1.bf16.msra.mxu0 %v1530_v1 }
  0xb5   : >> { %820 = vmatprep.subr.bf16.mxu0 %v1532_v3 }
  0xb6   : >> { %860 = vmatpush1.bf16.msra.mxu1 %v1549_v10 }
  0xb7   : >> { %861 = vmatprep.subr.bf16.mxu1 %v1552_v11 }
  0xb8   : >> { %821 = vmatpush1.bf16.msra.mxu0 %v1536_v6 }
  0xb9   : >> { %822 = vmatprep.subr.bf16.mxu0 %v1538_v7 }
  0xba   : >> { %862 = vmatpush1.bf16.msra.mxu1 %v1555_v14 }
  0xbb   : >> { %863 = vmatprep.subr.bf16.mxu1 %v1558_v15 }
  0xbc   : >> { %823 = vmatpush1.bf16.msra.mxu0 %v1542_v12 }
  0xbd   : >> { %824 = vmatprep.subr.bf16.mxu0 %v1544_v13 }
  0xbe   : >> { %864 = vmatpush1.bf16.msra.mxu1 %v1561_v22 }
  0xbf   : >> { %865 = vmatprep.subr.bf16.mxu1 %v1562_v23 }
  0xc0   : >> { %825 = vmatpush1.bf16.msra.mxu0 %v1548_v16 }
  0xc1   : >> { %826 = vmatprep.subr.bf16.mxu0 %v1550_v21 }
  0xc2   : >> { %866 = vmatpush1.bf16.msra.mxu1 %v1564_v26 }
  0xc3   : >> { %867 = vmatprep.subr.bf16.mxu1 %v1565_v27 }
  0xc4   : >> { %827 = vmatpush1.bf16.msra.mxu0 %v1554_v24 }
  0xc5   : >> { %828 = vmatprep.subr.bf16.mxu0 %v1556_v25 }
  0xc6   : >> { %868 = vmatpush1.bf16.msra.mxu1 %v1567_v30 }
  0xc7   : >> { %869 = vmatprep.subr.bf16.mxu1 %v1568_v31 }
  0xc8   : >> { %829 = vmatpush1.bf16.msra.mxu0 %v1560_v28 }
  0xca   : >> { %870 = vmatpush1.bf16.msra.mxu1 %v1570_v33 }
  0xcb   : >> { %831 = vmatmul.mubr.bf16.vlgmr.msra.gmra.mrb[0].mxu0 %v412_v32 }
  0xcd   : >> { %872 = vmatmul.mubr.bf16.vlgmr.msra.gmra.mrb[0].mxu1 %v412_v32 }
 0x10c   : >> { %v910_v58 = vpop.permute.xlu0 %909 }
 0x10d   : >> { %vm911_vm1 = vcmp.eq.s32.totalorder %v910_v58, 1 }
 0x19e   : >> { %v832_v34 = vpop.f32.mrb[0].mxu0 }
 0x19f   : >> { %v833_v35 = vadd.f32 %v832_v34, %v2064_v17  ;;  %v834_v36 = vpop.f32.mrb[1].mxu0 }
 0x1a0   : >> { %v835_v37 = vadd.f32 %v834_v36, %v2066_v18  ;;  %v836_v38 = vpop.f32.mrb[2].mxu0  ;;  %v873_v42 = vpop.f32.mrb[0].mxu1 }
 0x1a1   : >> { %v1295_v39 = vmul.f32 -1.442695, %v833_v35  ;;  %v837_v40 = vpop.f32.mrb[3].mxu0  ;;  %v875_v43 = vpop.f32.mrb[1].mxu1  ;;  %v874_v48 = vadd.f32 %v873_v42, %v2068_v19 }
 0x1a2   : >> { %v1296_v41 = vmul.f32 -1.442695, %v835_v37  ;;  %v876_v44 = vadd.f32 %v875_v43, %v2070_v20  ;;  %v877_v45 = vpop.f32.mrb[2].mxu1 }
 0x1a3   : >> { %1571 = vpow2.f32 %v1295_v39  ;;  %v878_v46 = vpop.f32.mrb[3].mxu1 }
 0x1a4   : >> { %1573 = vpow2.f32 %v1296_v41  ;;  %v1297_v47 = vmul.f32 -1.442695, %v876_v44 }
 0x1a6   : >> { %1575 = vpow2.f32 %v1297_v47 }
 0x1a7   : >> { %1577 = vtanh.f32 %v874_v48 }
 0x1ad   : >> { %v1572_v49 = vpop.eup %1571 }
 0x1ae   : >> { %v1574_v50 = vpop.eup %1573  ;;  %v883_v51 = vadd.f32 1.0, %v1572_v49 }
 0x1af   : >> { %v889_v52 = vadd.f32 1.0, %v1574_v50 }
 0x1b0   : >> { %1579 = vrcp.f32 %v883_v51  ;;  %v1576_v53 = vpop.eup %1575 }
 0x1b1   : >> { %1581 = vrcp.f32 %v889_v52  ;;  %v1578_v54 = vpop.eup %1577  ;;  %v896_v57 = vadd.f32 1.0, %v1576_v53 }
 0x1b3   : >> { %1583 = vrcp.f32 %v896_v57 }
 0x1ba   : >> { %v1580_v56 = vpop.eup %1579 }
 0x1bb   : >> { %v1582_v59 = vpop.eup %1581  ;;  %v901_v60 = vmul.f32 %v1580_v56, %v1578_v54 }
 0x1bc   : >> { %v900_v61 = vmul.f32 %v1582_v59, %v899_v55 }
 0x1bd   : >> { %v1584_v1 = vpop.eup %1583 }
 0x1be   : >> { %v902_v62 = vadd.f32 %v901_v60, %v900_v61 }
 0x1c0   : >> { %1585 = vtanh.f32 %v902_v62  ;;  %v912_v63 = vsel %vm911_vm1, %v902_v62, %v899_v55 }
 0x1c1   : >> { %913 = vst [vmem:[#allocation4] sm:$0xff] %v912_v63 }
 0x1c8   : > { %407 = sbr.rel (!%p404_p13) target bundleno = 138 (0x8a), region = 129 }
 0x1ca   : >> { %v1586_v2 = vpop.eup %1585 }
 0x1cb   : >> { %v904_v3 = vmul.f32 %v1586_v2, %v1584_v1 }
 0x1cd   : >> { %v915_v4 = vsel %vm911_vm1, %v904_v3, %v2120_v0 }
 0x1ce   : >> { %916 = vst [vmem:[#allocation3] sm:$0xff] %v915_v4  ;;  %918 = vst [vmem:[%s2146_s28] sm:$0xff] %v915_v4 }
 0x1cf PF: > { %p2277_p12 = scmp.ne.s32.totalorder %s1901_s0, 0 }
 0x1d1   : > { %921 = sbr.rel (%p2277_p12) target bundleno = 472 (0x1d8), region = 71 }
 0x1d5   : > { %v922_v5 = vld [vmem:[#allocation3] sm:$0xff] (!%p2277_p12) }
 0x1d6   : > { %923 = vst [vmem:[#allocation14] sm:$0xff] (!%p2277_p12), %v922_v5 }
 0x1d8 PF: > { %p1299_p8 = scmp.ne.s32.totalorder %s1901_s0, 1 }
 0x1d9   : > { %v930_v0 = vld [vmem:[#allocation2] sm:$0xff] (!%p1299_p8)  ;;  %v931_v6 = vld [vmem:[#allocation2 + $0x8] sm:$0xff] (!%p1299_p8)  ;;  %v932_v7 = vld [vmem:[#allocation2 + $0x10] sm:$0xff] (!%p1299_p8)  ;;  %v1058_v1 = vand.u32 (!%p1299_p8), 127, %v380_v8 }
 0x1da   : > { %927 = sbr.rel (%p1299_p8) target bundleno = 1046 (0x416), region = 75  ;;  %v933_v10 = vld [vmem:[#allocation2 + $0x18] sm:$0xff] (!%p1299_p8)  ;;  %v934_v11 = vld [vmem:[#allocation2 + $0x20] sm:$0xff] (!%p1299_p8)  ;;  %v935_v12 = vld [vmem:[#allocation2 + $0x28] sm:$0xff] (!%p1299_p8)  ;;  %938 = vst [vmem:[#allocation16] sm:$0xff] (!%p1299_p8), %v930_v0 }
 0x1db   : > { %939 = vst [vmem:[#allocation16 + $0x8] sm:$0xff] (!%p1299_p8), %v931_v6  ;;  %940 = vst [vmem:[#allocation16 + $0x10] sm:$0xff] (!%p1299_p8), %v932_v7  ;;  %v936_v13 = vld [vmem:[#allocation2 + $0x30] sm:$0xff] (!%p1299_p8)  ;;  %v937_v9 = vld [vmem:[#allocation2 + $0x38] sm:$0xff] (!%p1299_p8)  ;;  %vm1059_vm2 = vcmp.lt.s32.totalorder (!%p1299_p8), %v1058_v1, 3 }
 0x1dc   : > { %941 = vst [vmem:[#allocation16 + $0x18] sm:$0xff] (!%p1299_p8), %v933_v10  ;;  %942 = vst [vmem:[#allocation16 + $0x20] sm:$0xff] (!%p1299_p8), %v934_v11  ;;  %v964_v17 = vld [vmem:[#allocation12 + $0x80] sm:$0xff] (!%p1299_p8)  ;;  %v965_v18 = vld [vmem:[#allocation12 + $0x88] sm:$0xff] (!%p1299_p8) }
 0x1dd   : > { %943 = vst [vmem:[#allocation16 + $0x28] sm:$0xff] (!%p1299_p8), %v935_v12  ;;  %944 = vst [vmem:[#allocation16 + $0x30] sm:$0xff] (!%p1299_p8), %v936_v13  ;;  %v948_v19 = vld [vmem:[#allocation12] sm:$0xff] (!%p1299_p8)  ;;  %v949_v20 = vld [vmem:[#allocation12 + $0x8] sm:$0xff] (!%p1299_p8)  ;;  %v1345_v14 = vpack.c.bf16 (!%p1299_p8), %v965_v18, %v964_v17 }
 0x1de   : > { %945 = vst [vmem:[#allocation16 + $0x38] sm:$0xff] (!%p1299_p8), %v937_v9  ;;  %v1347_v15 = vpack.c.bf16 (!%p1299_p8), %v949_v20, %v948_v19  ;;  %v966_v16 = vld [vmem:[#allocation12 + $0x90] sm:$0xff] (!%p1299_p8)  ;;  %v967_v21 = vld [vmem:[#allocation12 + $0x98] sm:$0xff] (!%p1299_p8)  ;;  %v968_v25 = vld [vmem:[#allocation12 + $0xa0] sm:$0xff] (!%p1299_p8) }
 0x1df   : > { %v950_v22 = vld [vmem:[#allocation12 + $0x10] sm:$0xff] (!%p1299_p8)  ;;  %v1349_v23 = vpack.c.bf16 (!%p1299_p8), %v967_v21, %v966_v16  ;;  %v951_v24 = vld [vmem:[#allocation12 + $0x18] sm:$0xff] (!%p1299_p8)  ;;  %v969_v26 = vld [vmem:[#allocation12 + $0xa8] sm:$0xff] (!%p1299_p8)  ;;  %1346 = vmatprep.subr.bf16.mxu0 (!%p1299_p8), %v1345_v14 }
 0x1e0   : > { %1348 = vmatpush3.bf16.msra.mxu0 (!%p1299_p8), %v1347_v15  ;;  %v1351_v27 = vpack.c.bf16 (!%p1299_p8), %v951_v24, %v950_v22  ;;  %v1353_v28 = vpack.c.bf16 (!%p1299_p8), %v969_v26, %v968_v25  ;;  %v952_v29 = vld [vmem:[#allocation12 + $0x20] sm:$0xff] (!%p1299_p8)  ;;  %v953_v30 = vld [vmem:[#allocation12 + $0x28] sm:$0xff] (!%p1299_p8)  ;;  %v970_v31 = vld [vmem:[#allocation12 + $0xb0] sm:$0xff] (!%p1299_p8) }
 0x1e1   : > { %1350 = vmatprep.subr.bf16.mxu0 %v1349_v23  ;;  %v971_v32 = vld [vmem:[#allocation12 + $0xb8] sm:$0xff]  ;;  %v1355_v33 = vpack.c.bf16 %v953_v30, %v952_v29  ;;  %v954_v35 = vld [vmem:[#allocation12 + $0x30] sm:$0xff]  ;;  %v972_v37 = vld [vmem:[#allocation12 + $0xc0] sm:$0xff] }
 0x1e2   : > { %v1357_v34 = vpack.c.bf16 %v971_v32, %v970_v31  ;;  %v955_v36 = vld [vmem:[#allocation12 + $0x38] sm:$0xff]  ;;  %v973_v38 = vld [vmem:[#allocation12 + $0xc8] sm:$0xff]  ;;  %v928_v39 = vld [vmem:[#allocation3] sm:$0xff] }
 0x1e3   : > { %929 = vst [vmem:[#allocation14 + $0x8] sm:$0xff] %v928_v39  ;;  %1051 = vmatprep.mubr.f32.mxu0 %v928_v39  ;;  %v1359_v40 = vpack.c.bf16 %v955_v36, %v954_v35  ;;  %v1361_v41 = vpack.c.bf16 %v973_v38, %v972_v37  ;;  %v956_v42 = vld [vmem:[#allocation12 + $0x40] sm:$0xff]  ;;  %v957_v43 = vld [vmem:[#allocation12 + $0x48] sm:$0xff]  ;;  %v974_v44 = vld [vmem:[#allocation12 + $0xd0] sm:$0xff] }
 0x1e4   : > { %1352 = vmatpush3.bf16.msra.mxu0 %v1351_v27  ;;  %v975_v45 = vld [vmem:[#allocation12 + $0xd8] sm:$0xff]  ;;  %v1363_v46 = vpack.c.bf16 %v957_v43, %v956_v42  ;;  %v958_v48 = vld [vmem:[#allocation12 + $0x50] sm:$0xff]  ;;  %v976_v50 = vld [vmem:[#allocation12 + $0xe0] sm:$0xff] }
 0x1e5   : > { %1354 = vmatprep.subr.bf16.mxu0 %v1353_v28  ;;  %v1365_v47 = vpack.c.bf16 %v975_v45, %v974_v44  ;;  %v959_v49 = vld [vmem:[#allocation12 + $0x58] sm:$0xff]  ;;  %v977_v51 = vld [vmem:[#allocation12 + $0xe8] sm:$0xff]  ;;  %v960_v54 = vld [vmem:[#allocation12 + $0x60] sm:$0xff] }
 0x1e6   : > { %v1367_v52 = vpack.c.bf16 %v959_v49, %v958_v48  ;;  %v1369_v53 = vpack.c.bf16 %v977_v51, %v976_v50  ;;  %v961_v55 = vld [vmem:[#allocation12 + $0x68] sm:$0xff]  ;;  %v978_v56 = vld [vmem:[#allocation12 + $0xf0] sm:$0xff]  ;;  %v979_v57 = vld [vmem:[#allocation12 + $0xf8] sm:$0xff] }
 0x1e7   : > { %v1371_v58 = vpack.c.bf16 %v961_v55, %v960_v54  ;;  %v1373_v59 = vpack.c.bf16 %v979_v57, %v978_v56  ;;  %v962_v60 = vld [vmem:[#allocation12 + $0x70] sm:$0xff]  ;;  %v963_v61 = vld [vmem:[#allocation12 + $0x78] sm:$0xff]  ;;  %v946_v63 = vld [vmem:[#allocation14] sm:$0xff] }
 0x1e8   : > { %1356 = vmatpush3.bf16.msra.mxu0 %v1355_v33  ;;  %v1375_v62 = vpack.c.bf16 %v963_v61, %v962_v60  ;;  %v1300_v3 = vld [vmem:[%s2251_s6] ss:$0 sm:$0xff] }
 0x1e9   : > { %1358 = vmatprep.subr.bf16.mxu0 %v1357_v34 }
 0x1ec   : > { %1360 = vmatpush3.bf16.msra.mxu0 %v1359_v40 }
 0x1ed   : > { %1362 = vmatprep.subr.bf16.mxu0 %v1361_v41 }
 0x1f0   : > { %1364 = vmatpush3.bf16.msra.mxu0 %v1363_v46 }
 0x1f1   : > { %1366 = vmatprep.subr.bf16.mxu0 %v1365_v47 }
 0x1f4   : > { %1368 = vmatpush3.bf16.msra.mxu0 %v1367_v52 }
 0x1f5   : > { %1370 = vmatprep.subr.bf16.mxu0 %v1369_v53 }
 0x1f8   : > { %1372 = vmatpush3.bf16.msra.mxu0 %v1371_v58 }
 0x1f9   : > { %1374 = vmatprep.subr.bf16.mxu0 %v1373_v59 }
 0x1fc   : > { %1376 = vmatpush3.bf16.msra.mxu0 %v1375_v62 }
 0x1ff   : > { %1052 = vmatmul.mubr.f32.vlgmr.msra.gmra.mrb[0].mxu0 %v946_v63 }
 0x2d2   : > { %v1342_v2 = vpop.f32.mrb[0].mxu0 }
 0x2d3   : > { %v1343_v4 = vpop.f32.mrb[1].mxu0 }
 0x2d4   : > { %v1344_v5 = vadd.f32 %v1343_v4, %v1342_v2 }
 0x2d6   : > { %v1054_v0 = vadd.f32 %v1344_v5, %v1300_v3 }
 0x2d8   : > { %v1060_v6 = vsel %vm1059_vm2, %v1054_v0, -1e+30 }
 0x2d9   : > { %1061 = vmax.xlane.f32.xlu0 %v1060_v6 }
 0x366   : > { %v1062_v7 = vpop.xlane.xlu0 %1061 }
 0x367   : > { %v1063_v10 = vsub.f32 %v1060_v6, %v1062_v7 }
 0x369   : > { %v1064_v11 = vmul.f32 1.442695, %v1063_v10 }
 0x36b   : > { %1587 = vpow2.f32 %v1064_v11 }
 0x375   : > { %v1588_v12 = vpop.eup %1587 }
 0x376   : > { %1066 = vadd.xlane.f32.xlu0 %v1588_v12 }
 0x403   : > { %v1067_v13 = vpop.xlane.xlu0 %1066 }
 0x404   : > { %1589 = vlog2.f32 %v1067_v13 }
 0x40e   : > { %v1590_v8 = vpop.eup %1589 }
 0x40f   : > { %v1069_v9 = vmul.f32 0.6931472, %v1590_v8 }
 0x411   : > { %v1070_v17 = vadd.f32 %v1069_v9, %v1062_v7 }
 0x413   : > { %v1071_v18 = vsub.f32 %v1060_v6, %v1070_v17 }
 0x415   : > { %1072 = vst [vmem:[#allocation13] sm:$0xff] %v1071_v18 }
 0x416 PF: > { %p1415_p10 = scmp.eq.s32.totalorder %s1901_s0, 1  ;;  %s1824_s24 = smov [#allocation14]  }
 0x417   : > { %s1091_s17 = sshll.u32 %s1824_s24, 4  ;;  %s1825_s19 = smov [#allocation13]   ;;  %s1092_s17 = int_to_ptr.vmem [resolvable:$true] %s1091_s17 }
 0x418   : > { %s1080_s22 = sshll.u32 %s1825_s19, 4  ;;  %s1677_s30 = scalar_lea.vmem %s1092_s17, 256  ;;  %s1081_s22 = int_to_ptr.vmem [resolvable:$true] %s1080_s22 }
 0x419   : > { %p1678_p0 = scmp.ne.s32.totalorder %s1092_s17, %s1677_s30  ;;  %p1684_p1 = scmp.lt.s32.totalorder %s1092_s17, %s1092_s17 }
 0x41a   : > { %p1685_p3 = scmp.lt.s32.totalorder %s1677_s30, %s1677_s30 }
 0x41b   : > { %p1679_p5 = pnand %p1678_p0, %p1415_p10 }
 0x41c   : > { %p1686_p2 = por %p1685_p3, %p1684_p1 }
 0x41d   : > { %p1680_p9 = pneg %p1679_p5 }
 0x41f   : > { %p1687_p6 = pnand %p1686_p2, %p1680_p9 }
 0x421   : > { %1690 = shalt.err (!%p1687_p6)
}
 0x422   : > { %s1691_s26 = scalar_lea.hbm %s2253_s8, 256 }
 0x423   : > { %p1692_p4 = scmp.ne.s32.totalorder %s2253_s8, %s1691_s26  ;;  %p1697_p13 = scmp.lt.u32.totalorder %s1691_s26, %s2253_s8 }
 0x425   : > { %p1693_p7 = pnand %p1692_p4, %p1415_p10 }
 0x427   : > { %p1694_p11 = pneg %p1693_p7 }
 0x429   : > { %p1699_p12 = pnand %p1697_p13, %p1694_p11 }
 0x42b   : > { %1702 = shalt.err (!%p1699_p12)
}
 0x42c   : > { %1390 = dma.vmem_to_hbm [thread:$0]  (%p1415_p10), %s1092_s17, 256, %s2253_s8, [#allocation15]  }
 0x42d   : > { %s1703_s14 = scalar_lea.vmem %s1081_s22, 128  ;;  %p1710_p9 = scmp.lt.s32.totalorder %s1081_s22, %s1081_s22 }
 0x42e   : > { %p1704_p8 = scmp.ne.s32.totalorder %s1081_s22, %s1703_s14  ;;  %p1711_p1 = scmp.lt.s32.totalorder %s1703_s14, %s1703_s14 }
 0x430   : > { %p1705_p0 = pnand %p1704_p8, %p1415_p10  ;;  %p1712_p3 = por %p1711_p1, %p1710_p9 }
 0x432   : > { %p1706_p5 = pneg %p1705_p0 }
 0x434   : > { %p1713_p2 = pnand %p1712_p3, %p1706_p5 }
 0x436   : > { %1716 = shalt.err (!%p1713_p2)
}
 0x437   : > { %s1717_s29 = scalar_lea.hbm %s2252_s7, 128 }
 0x438   : > { %p1718_p6 = scmp.ne.s32.totalorder %s2252_s7, %s1717_s29  ;;  %p1723_p11 = scmp.lt.u32.totalorder %s1717_s29, %s2252_s7 }
 0x43a   : > { %p1719_p4 = pnand %p1718_p6, %p1415_p10 }
 0x43c   : > { %p1720_p7 = pneg %p1719_p4 }
 0x43e   : > { %p1725_p13 = pnand %p1723_p11, %p1720_p7 }
 0x440   : > { %1728 = shalt.err (!%p1725_p13)
}
 0x441   : > { %1388 = dma.vmem_to_hbm [thread:$0]  (%p1415_p10), %s1081_s22, 128, %s2252_s7, [#allocation9]  }
 0x442   : > { %s1826_s21 = smov [#allocation16]  }
 0x443   : > { %s1101_s26 = sshll.u32 %s1826_s21, 4  ;;  %s1102_s26 = int_to_ptr.vmem [resolvable:$true] %s1101_s26 }
 0x444   : > { %s1729_s11 = scalar_lea.vmem %s1102_s26, 1024  ;;  %p1736_p5 = scmp.lt.s32.totalorder %s1102_s26, %s1102_s26 }
 0x445   : > { %p1730_p12 = scmp.ne.s32.totalorder %s1102_s26, %s1729_s11  ;;  %p1737_p9 = scmp.lt.s32.totalorder %s1729_s11, %s1729_s11 }
 0x447   : > { %p1731_p8 = pnand %p1730_p12, %p1415_p10  ;;  %p1738_p1 = por %p1737_p9, %p1736_p5 }
 0x449   : > { %p1732_p0 = pneg %p1731_p8 }
 0x44b   : > { %p1739_p3 = pnand %p1738_p1, %p1732_p0 }
 0x44d   : > { %1742 = shalt.err (!%p1739_p3)
}
 0x44e   : > { %s1743_s20 = scalar_lea.hbm %s2254_s9, 1024 }
 0x44f   : > { %p1744_p2 = scmp.ne.s32.totalorder %s2254_s9, %s1743_s20  ;;  %p1749_p7 = scmp.lt.u32.totalorder %s1743_s20, %s2254_s9 }
 0x451   : > { %p1745_p6 = pnand %p1744_p2, %p1415_p10 }
 0x453   : > { %p1746_p4 = pneg %p1745_p6 }
 0x455   : > { %p1751_p11 = pnand %p1749_p7, %p1746_p4 }
 0x457   : > { %1754 = shalt.err (!%p1751_p11)
}
 0x458   : > { %s1827_s18 = smov 128   ;;  %s1828_s28 = smov 8  }
 0x459   : > { %1392 = dma.vmem_to_hbm [thread:$0]  (%p1415_p10), %s1102_s26, 1024, %s2254_s9, [#allocation15], %s1827_s18, %s1827_s18, %s1828_s28  }
 0x45a   : > { %1788 = dma.done.wait (%p1415_p10), [#allocation9], 128  }
 0x45b   : > { %1790 = vsyncadd (%p1415_p10), [#allocation9], 4294967168 }
 0x45c   : > { %1792 = dma.done.wait (%p1415_p10), [#allocation15], 1280  }
 0x45d   : > { %1794 = vsyncadd (%p1415_p10), [#allocation15], 4294966016 }
 0x45e PF: > { %s2278_s14 = sld [smem:[#allocation22_spill]]  ;;  %s2279_s24 = sld [smem:[#allocation23_spill]] }
 0x45f   : > { %s2280_s11 = smov %s1801_s12  ;;  %s2281_s12 = smov %s1805_s13 }
 0x464   : > { %p24_p13 = scmp.ge.s32.totalorder %s2278_s14, 4   ;;  %s2282_s13 = smov %s2279_s24 }
 0x466   :  { %26 = sbr.rel (!%p24_p13) target bundleno = 8 (0x8), region = 140 }
 0x46d   :  { %1125 = vsyncpa [#allocation8], 1 }
 0x46e   :  { %1127 = vsyncpa [#allocation8 + $0x1], 1 }
 0x46f   :  { %1128 = vsyncpa [#allocation11], 1 }
 0x470   :  { %1130 = vsyncpa [#allocation11 + $0x1], 1 }
 0x471   :  { %1131 = vsyncpa [#allocation9], 1 }
 0x472   :  { %1133 = vsyncpa [#allocation9 + $0x1], 1 }
 0x473   :  { %1134 = vsyncpa [#allocation15], 1 }

</bundles_post_ra>
